<compile_context>
chip_gen: v7x
topology: tpu7x:2x2x1
jax: 0.10.0
libtpu: 0.0.40
codegen_flags: <defaults>
</compile_context>

<pallas_src>
import jax
import jax.numpy as jnp
from jax.experimental import pallas as pl
from jax.experimental.pallas import tpu as pltpu  # noqa: F401  (TPU memory spaces etc.)

HIDDEN = 22            # hidden_size
NUM_FEATURES = 8       # dataset.num_features (synthetic)
GCN_LAYERS = 3
FCN_NEURONS = [66, 30, 1]   # fcn_layers = 3  (66 = 3 readouts * HIDDEN)
POOL_LOC = (1, 2)      # pool_local -> readout after conv 1 and conv 2
LEAKY_SLOPE = 0.01
DROPOUT_P = 0.5


# ---------------------------------------------------------------------------
# Fused forward-pass kernel
# ---------------------------------------------------------------------------
def _fused_forward_kernel(
        x_ref, adj_ref, pool_ref,
        g1w_ref, g1b_ref, g2w_ref, g2b_ref, g3w_ref, g3b_ref,
        f1w_ref, f1b_ref, f2w_ref, f2b_ref,
        m1_ref, m2_ref,
        o_ref):
    """Entire Model.forward in one kernel; only the final (G,1) leaves VMEM."""
    adj = adj_ref[...]
    pool = pool_ref[...]

    def gcn_relu(h, w_ref, b_ref):
        # GraphConv(aggr='mean'): relu(h @ W_root + (adj @ h) @ W_rel + b),
        # computed as a single MXU matmul with W = [W_root; W_rel].
        agg = jnp.dot(adj, h, preferred_element_type=jnp.float32)
        ha = jnp.concatenate([h, agg], axis=1)
        out = (jnp.dot(ha, w_ref[...], preferred_element_type=jnp.float32)
               + b_ref[...])
        return jnp.maximum(out, 0.0)

    def readout(h):
        # global_mean_pool as a dense matmul [G, N] @ [N, H].
        return jnp.dot(pool, h, preferred_element_type=jnp.float32)

    h = gcn_relu(x_ref[...], g1w_ref, g1b_ref)
    r1 = readout(h)
    # TODO(synk): ASAPooling (attention-scored top-k node selection +
    # edge/cluster re-wiring) has no clean Pallas equivalent; the graph is
    # left un-coarsened here while keeping the readout locations.
    h = gcn_relu(h, g2w_ref, g2b_ref)
    r2 = readout(h)
    h = gcn_relu(h, g3w_ref, g3b_ref)
    r3 = readout(h)

    # JumpingKnowledge(mode='cat') -> (G, 3*HIDDEN)
    f = jnp.concatenate([r1, r2, r3], axis=1)

    scale = 1.0 / (1.0 - DROPOUT_P)

    # FCNCell 1: dropout(p=0.5) -> Linear(66, 30) -> LeakyReLU(0.01)
    f = f * m1_ref[...] * scale
    f = jnp.dot(f, f1w_ref[...], preferred_element_type=jnp.float32) + f1b_ref[...]
    f = jnp.where(f > 0.0, f, LEAKY_SLOPE * f)

    # FCNCell 2: dropout(p=0.5) -> Linear(30, 1) -> LeakyReLU(0.01)
    f = f * m2_ref[...] * scale
    f = jnp.dot(f, f2w_ref[...], preferred_element_type=jnp.float32) + f2b_ref[...]
    f = jnp.where(f > 0.0, f, LEAKY_SLOPE * f)

    o_ref[...] = f


# ---------------------------------------------------------------------------
# Model wrapper
# ---------------------------------------------------------------------------
def model_forward(x, adj, pool_mat, params, dropout_key):
    n, f_in = x.shape
    g = pool_mat.shape[0]

    # Dropout keep-masks, Bernoulli(1 - p), runtime-keyed (training semantics).
    keys = jax.random.split(dropout_key, len(params["fcn"]))
    masks = [
        jax.random.bernoulli(k, 1.0 - DROPOUT_P, (g, w.shape[0])).astype(jnp.float32)
        for k, (w, _) in zip(keys, params["fcn"])
    ]

    # Advisory cost estimate (kernel is tiny; helps XLA schedule it tightly).
    flops = 0
    dims = [f_in] + [HIDDEN] * GCN_LAYERS
    for fi, fo in zip(dims[:-1], dims[1:]):
        flops += 2 * n * n * fi          # adj @ h
        flops += 2 * n * (2 * fi) * fo   # [h|agg] @ [W_root; W_rel]
    flops += GCN_LAYERS * 2 * g * n * HIDDEN          # pool readouts
    for fi, fo in zip(FCN_NEURONS[:-1], FCN_NEURONS[1:]):
        flops += 2 * g * fi * fo

    args = [x, adj, pool_mat]
    for w_cat, b in params["gcn"]:
        args += [w_cat, b]
    for w, b in params["fcn"]:
        args += [w, b]
    args += masks

    bytes_accessed = sum(int(a.size) * 4 for a in args) + g * FCN_NEURONS[-1] * 4

    return pl.pallas_call(
        _fused_forward_kernel,
        out_shape=jax.ShapeDtypeStruct((g, FCN_NEURONS[-1]), jnp.float32),
        cost_estimate=pl.CostEstimate(
            flops=flops, transcendentals=0, bytes_accessed=bytes_accessed),
    )(*args)


def init_params(key):
    """GCN weights are stored pre-concatenated: W = [W_root; W_rel] (2*fin, fout)."""
    params = {"gcn": [], "fcn": []}
    dims = [NUM_FEATURES] + [HIDDEN] * GCN_LAYERS
    for fin, fout in zip(dims[:-1], dims[1:]):
        key, k1, k2, k3 = jax.random.split(key, 4)
        w_root = jax.random.normal(k1, (fin, fout), jnp.float32) * 0.1
        w_rel = jax.random.normal(k2, (fin, fout), jnp.float32) * 0.1
        b = jax.random.normal(k3, (fout,), jnp.float32) * 0.01
        w_cat = jnp.concatenate([w_root, w_rel], axis=0)   # (2*fin, fout)
        params["gcn"].append((w_cat, b.reshape(1, fout)))
    for fin, fout in zip(FCN_NEURONS[:-1], FCN_NEURONS[1:]):
        key, k1, k2 = jax.random.split(key, 3)
        w = jax.random.normal(k1, (fin, fout), jnp.float32) * 0.1
        b = jax.random.normal(k2, (fout,), jnp.float32) * 0.01
        params["fcn"].append((w, b.reshape(1, fout)))
    return params


if __name__ == "__main__":
    key = jax.random.PRNGKey(0)
    k_x, k_src, k_dst, k_params, k_drop = jax.random.split(key, 5)

    # Synthetic batch of G=2 graphs, 6 nodes each (N=12), NUM_FEATURES node feats.
    G, nodes_per_graph = 2, 6
    N = G * nodes_per_graph
    E = 10  # edges per graph

    x = jax.random.normal(k_x, (N, NUM_FEATURES), jnp.float32)

    # Random intra-graph edges -> dense mean-normalized adjacency.
    src = jax.random.randint(k_src, (G, E), 0, nodes_per_graph)
    dst = jax.random.randint(k_dst, (G, E), 0, nodes_per_graph)
    adj = jnp.zeros((N, N), jnp.float32)
    for gi in range(G):
        off = gi * nodes_per_graph
        adj = adj.at[dst[gi] + off, src[gi] + off].set(1.0)
    deg = jnp.sum(adj, axis=1, keepdims=True)
    adj = adj / jnp.maximum(deg, 1.0)   # mean aggregation (isolated nodes -> 0)

    # Batch-assignment matrix for global_mean_pool.
    batch_idx = jnp.repeat(jnp.arange(G), nodes_per_graph)
    pool_mat = (batch_idx[None, :] == jnp.arange(G)[:, None]).astype(jnp.float32)
    pool_mat = pool_mat / jnp.sum(pool_mat, axis=1, keepdims=True)

    params = init_params(k_params)

    out = model_forward(x, adj, pool_mat, params, dropout_key=k_drop)
    out = jax.block_until_ready(out)
    assert out.shape == (G, 1), out.shape
    print("KERNEL_OK")
</pallas_src>

<mosaic_0001>
module attributes {stable_mosaic.version = 11 : i64} {
  func.func @_fused_forward_kernel(%arg0: memref<12x8xf32, #tpu.memory_space<vmem>>, %arg1: memref<12x12xf32, #tpu.memory_space<vmem>>, %arg2: memref<2x12xf32, #tpu.memory_space<vmem>>, %arg3: memref<16x22xf32, #tpu.memory_space<vmem>>, %arg4: memref<1x22xf32, #tpu.memory_space<vmem>>, %arg5: memref<44x22xf32, #tpu.memory_space<vmem>>, %arg6: memref<1x22xf32, #tpu.memory_space<vmem>>, %arg7: memref<44x22xf32, #tpu.memory_space<vmem>>, %arg8: memref<1x22xf32, #tpu.memory_space<vmem>>, %arg9: memref<66x30xf32, #tpu.memory_space<vmem>>, %arg10: memref<1x30xf32, #tpu.memory_space<vmem>>, %arg11: memref<30x1xf32, #tpu.memory_space<vmem>>, %arg12: memref<1x1xf32, #tpu.memory_space<vmem>>, %arg13: memref<2x66xf32, #tpu.memory_space<vmem>>, %arg14: memref<2x30xf32, #tpu.memory_space<vmem>>, %arg15: memref<2x1xf32, #tpu.memory_space<vmem>>) attributes {dimension_semantics = [], scalar_prefetch = 0 : i64, scratch_operands = 0 : i64, tpu.core_type = #tpu.core_type<tc>} {
    %c0 = arith.constant 0 : index
    %c0_0 = arith.constant 0 : index
    %0 = vector.load %arg1[%c0, %c0_0] : memref<12x12xf32, #tpu.memory_space<vmem>>, vector<12x12xf32>
    %c0_1 = arith.constant 0 : index
    %c0_2 = arith.constant 0 : index
    %1 = vector.load %arg2[%c0_1, %c0_2] : memref<2x12xf32, #tpu.memory_space<vmem>>, vector<2x12xf32>
    %c0_3 = arith.constant 0 : index
    %c0_4 = arith.constant 0 : index
    %2 = vector.load %arg0[%c0_3, %c0_4] : memref<12x8xf32, #tpu.memory_space<vmem>>, vector<12x8xf32>
    %cst = arith.constant dense<0.000000e+00> : vector<12x8xf32>
    %3 = tpu.matmul %0, %2, %cst {dimension_numbers = #tpu.dot_dimension_numbers<[1], [0], [0], [1], [0, 0, 1, 1], [], []>} : vector<12x12xf32>, vector<12x8xf32>, vector<12x8xf32> -> vector<12x8xf32>
    %4 = tpu.concatenate %2, %3 in 1 : vector<12x8xf32>, vector<12x8xf32> -> vector<12x16xf32>
    %c0_5 = arith.constant 0 : index
    %c0_6 = arith.constant 0 : index
    %5 = vector.load %arg3[%c0_5, %c0_6] : memref<16x22xf32, #tpu.memory_space<vmem>>, vector<16x22xf32>
    %cst_7 = arith.constant dense<0.000000e+00> : vector<12x22xf32>
    %6 = tpu.matmul %4, %5, %cst_7 {dimension_numbers = #tpu.dot_dimension_numbers<[1], [0], [0], [1], [0, 0, 1, 1], [], []>} : vector<12x16xf32>, vector<16x22xf32>, vector<12x22xf32> -> vector<12x22xf32>
    %c0_8 = arith.constant 0 : index
    %c0_9 = arith.constant 0 : index
    %7 = vector.load %arg4[%c0_8, %c0_9] : memref<1x22xf32, #tpu.memory_space<vmem>>, vector<1x22xf32>
    %8 = vector.broadcast %7 : vector<1x22xf32> to vector<12x22xf32>
    %9 = arith.addf %6, %8 : vector<12x22xf32>
    %cst_10 = arith.constant 0.000000e+00 : f32
    %10 = vector.broadcast %cst_10 : f32 to vector<12x22xf32>
    %11 = arith.maximumf %9, %10 : vector<12x22xf32>
    %cst_11 = arith.constant dense<0.000000e+00> : vector<2x22xf32>
    %12 = tpu.matmul %1, %11, %cst_11 {dimension_numbers = #tpu.dot_dimension_numbers<[1], [0], [0], [1], [0, 0, 1, 1], [], []>} : vector<2x12xf32>, vector<12x22xf32>, vector<2x22xf32> -> vector<2x22xf32>
    %cst_12 = arith.constant dense<0.000000e+00> : vector<12x22xf32>
    %13 = tpu.matmul %0, %11, %cst_12 {dimension_numbers = #tpu.dot_dimension_numbers<[1], [0], [0], [1], [0, 0, 1, 1], [], []>} : vector<12x12xf32>, vector<12x22xf32>, vector<12x22xf32> -> vector<12x22xf32>
    %14 = tpu.concatenate %11, %13 in 1 : vector<12x22xf32>, vector<12x22xf32> -> vector<12x44xf32>
    %c0_13 = arith.constant 0 : index
    %c0_14 = arith.constant 0 : index
    %15 = vector.load %arg5[%c0_13, %c0_14] : memref<44x22xf32, #tpu.memory_space<vmem>>, vector<44x22xf32>
    %cst_15 = arith.constant dense<0.000000e+00> : vector<12x22xf32>
    %16 = tpu.matmul %14, %15, %cst_15 {dimension_numbers = #tpu.dot_dimension_numbers<[1], [0], [0], [1], [0, 0, 1, 1], [], []>} : vector<12x44xf32>, vector<44x22xf32>, vector<12x22xf32> -> vector<12x22xf32>
    %c0_16 = arith.constant 0 : index
    %c0_17 = arith.constant 0 : index
    %17 = vector.load %arg6[%c0_16, %c0_17] : memref<1x22xf32, #tpu.memory_space<vmem>>, vector<1x22xf32>
    %18 = vector.broadcast %17 : vector<1x22xf32> to vector<12x22xf32>
    %19 = arith.addf %16, %18 : vector<12x22xf32>
    %cst_18 = arith.constant 0.000000e+00 : f32
    %20 = vector.broadcast %cst_18 : f32 to vector<12x22xf32>
    %21 = arith.maximumf %19, %20 : vector<12x22xf32>
    %cst_19 = arith.constant dense<0.000000e+00> : vector<2x22xf32>
    %22 = tpu.matmul %1, %21, %cst_19 {dimension_numbers = #tpu.dot_dimension_numbers<[1], [0], [0], [1], [0, 0, 1, 1], [], []>} : vector<2x12xf32>, vector<12x22xf32>, vector<2x22xf32> -> vector<2x22xf32>
    %cst_20 = arith.constant dense<0.000000e+00> : vector<12x22xf32>
    %23 = tpu.matmul %0, %21, %cst_20 {dimension_numbers = #tpu.dot_dimension_numbers<[1], [0], [0], [1], [0, 0, 1, 1], [], []>} : vector<12x12xf32>, vector<12x22xf32>, vector<12x22xf32> -> vector<12x22xf32>
    %24 = tpu.concatenate %21, %23 in 1 : vector<12x22xf32>, vector<12x22xf32> -> vector<12x44xf32>
    %c0_21 = arith.constant 0 : index
    %c0_22 = arith.constant 0 : index
    %25 = vector.load %arg7[%c0_21, %c0_22] : memref<44x22xf32, #tpu.memory_space<vmem>>, vector<44x22xf32>
    %cst_23 = arith.constant dense<0.000000e+00> : vector<12x22xf32>
    %26 = tpu.matmul %24, %25, %cst_23 {dimension_numbers = #tpu.dot_dimension_numbers<[1], [0], [0], [1], [0, 0, 1, 1], [], []>} : vector<12x44xf32>, vector<44x22xf32>, vector<12x22xf32> -> vector<12x22xf32>
    %c0_24 = arith.constant 0 : index
    %c0_25 = arith.constant 0 : index
    %27 = vector.load %arg8[%c0_24, %c0_25] : memref<1x22xf32, #tpu.memory_space<vmem>>, vector<1x22xf32>
    %28 = vector.broadcast %27 : vector<1x22xf32> to vector<12x22xf32>
    %29 = arith.addf %26, %28 : vector<12x22xf32>
    %cst_26 = arith.constant 0.000000e+00 : f32
    %30 = vector.broadcast %cst_26 : f32 to vector<12x22xf32>
    %31 = arith.maximumf %29, %30 : vector<12x22xf32>
    %cst_27 = arith.constant dense<0.000000e+00> : vector<2x22xf32>
    %32 = tpu.matmul %1, %31, %cst_27 {dimension_numbers = #tpu.dot_dimension_numbers<[1], [0], [0], [1], [0, 0, 1, 1], [], []>} : vector<2x12xf32>, vector<12x22xf32>, vector<2x22xf32> -> vector<2x22xf32>
    %33 = tpu.concatenate %12, %22, %32 in 1 : vector<2x22xf32>, vector<2x22xf32>, vector<2x22xf32> -> vector<2x66xf32>
    %c0_28 = arith.constant 0 : index
    %c0_29 = arith.constant 0 : index
    %34 = vector.load %arg13[%c0_28, %c0_29] : memref<2x66xf32, #tpu.memory_space<vmem>>, vector<2x66xf32>
    %35 = arith.mulf %33, %34 : vector<2x66xf32>
    %cst_30 = arith.constant 2.000000e+00 : f32
    %36 = vector.broadcast %cst_30 : f32 to vector<2x66xf32>
    %37 = arith.mulf %35, %36 : vector<2x66xf32>
    %c0_31 = arith.constant 0 : index
    %c0_32 = arith.constant 0 : index
    %38 = vector.load %arg9[%c0_31, %c0_32] : memref<66x30xf32, #tpu.memory_space<vmem>>, vector<66x30xf32>
    %cst_33 = arith.constant dense<0.000000e+00> : vector<2x30xf32>
    %39 = tpu.matmul %37, %38, %cst_33 {dimension_numbers = #tpu.dot_dimension_numbers<[1], [0], [0], [1], [0, 0, 1, 1], [], []>} : vector<2x66xf32>, vector<66x30xf32>, vector<2x30xf32> -> vector<2x30xf32>
    %c0_34 = arith.constant 0 : index
    %c0_35 = arith.constant 0 : index
    %40 = vector.load %arg10[%c0_34, %c0_35] : memref<1x30xf32, #tpu.memory_space<vmem>>, vector<1x30xf32>
    %41 = vector.broadcast %40 : vector<1x30xf32> to vector<2x30xf32>
    %42 = arith.addf %39, %41 : vector<2x30xf32>
    %cst_36 = arith.constant 0.000000e+00 : f32
    %43 = vector.broadcast %cst_36 : f32 to vector<2x30xf32>
    %44 = arith.cmpf ogt, %42, %43 : vector<2x30xf32>
    %cst_37 = arith.constant 0.00999999977 : f32
    %45 = vector.broadcast %cst_37 : f32 to vector<2x30xf32>
    %46 = arith.mulf %45, %42 : vector<2x30xf32>
    %47 = arith.select %44, %42, %46 : vector<2x30xi1>, vector<2x30xf32>
    %c0_38 = arith.constant 0 : index
    %c0_39 = arith.constant 0 : index
    %48 = vector.load %arg14[%c0_38, %c0_39] : memref<2x30xf32, #tpu.memory_space<vmem>>, vector<2x30xf32>
    %49 = arith.mulf %47, %48 : vector<2x30xf32>
    %cst_40 = arith.constant 2.000000e+00 : f32
    %50 = vector.broadcast %cst_40 : f32 to vector<2x30xf32>
    %51 = arith.mulf %49, %50 : vector<2x30xf32>
    %c0_41 = arith.constant 0 : index
    %c0_42 = arith.constant 0 : index
    %52 = vector.load %arg11[%c0_41, %c0_42] : memref<30x1xf32, #tpu.memory_space<vmem>>, vector<30x1xf32>
    %cst_43 = arith.constant dense<0.000000e+00> : vector<2x1xf32>
    %53 = tpu.matmul %51, %52, %cst_43 {dimension_numbers = #tpu.dot_dimension_numbers<[1], [0], [0], [1], [0, 0, 1, 1], [], []>} : vector<2x30xf32>, vector<30x1xf32>, vector<2x1xf32> -> vector<2x1xf32>
    %c0_44 = arith.constant 0 : index
    %c0_45 = arith.constant 0 : index
    %54 = vector.load %arg12[%c0_44, %c0_45] : memref<1x1xf32, #tpu.memory_space<vmem>>, vector<1x1xf32>
    %55 = vector.broadcast %54 : vector<1x1xf32> to vector<2x1xf32>
    %56 = arith.addf %53, %55 : vector<2x1xf32>
    %cst_46 = arith.constant 0.000000e+00 : f32
    %57 = vector.broadcast %cst_46 : f32 to vector<2x1xf32>
    %58 = arith.cmpf ogt, %56, %57 : vector<2x1xf32>
    %cst_47 = arith.constant 0.00999999977 : f32
    %59 = vector.broadcast %cst_47 : f32 to vector<2x1xf32>
    %60 = arith.mulf %59, %56 : vector<2x1xf32>
    %61 = arith.select %58, %56, %60 : vector<2x1xi1>, vector<2x1xf32>
    %c0_48 = arith.constant 0 : index
    %c0_49 = arith.constant 0 : index
    %62 = vector.load %arg15[%c0_48, %c0_49] : memref<2x1xf32, #tpu.memory_space<vmem>>, vector<2x1xf32>
    tpu.vector_store %arg15[%c0_48, %c0_49], %61 {strides = array<i32>} : memref<2x1xf32, #tpu.memory_space<vmem>>, vector<2x1xf32>,
    return
  }
}

</mosaic_0001>

<bundles_post_ra>
// kernel: tpu_custom_call.1
= control target key start
LH: loop header
LB: loop body
LE: loop exit
PB: predicated region body
PF: predicated region fallthrough
CT: control target
= control target key end

     0   :  { %vm64_vm0 = vcmask 1043456   ;;  %vm57_vm1 = vcmask 97280   ;;  %vm1337_vm2 = vmmov 1   ;;  %s1338_s29 = smov 8   ;;  %vm151_vm4 = vcmask 64512   ;;  %s1342_s26 = smov 22   ;;  %s1638_s0 = inlined_call_operand.vmem [shape: f32[12,8], index: 0, kind: input, shape index: {}]   ;;  %s1639_s1 = inlined_call_operand.vmem [shape: f32[12,12], index: 1, kind: input, shape index: {}]   ;;  %s1640_s3 = inlined_call_operand.vmem [shape: f32[16,22], index: 3, kind: input, shape index: {}]   ;;  %s1641_s4 = inlined_call_operand.vmem [shape: f32[1,22], index: 4, kind: input, shape index: {}]   ;;  %s1642_s2 = inlined_call_operand.vmem [shape: f32[2,12], index: 2, kind: input, shape index: {}]   ;;  %s1643_s5 = inlined_call_operand.vmem [shape: f32[44,22], index: 5, kind: input, shape index: {}]   ;;  %s1644_s6 = inlined_call_operand.vmem [shape: f32[1,22], index: 6, kind: input, shape index: {}]   ;;  %s1645_s7 = inlined_call_operand.vmem [shape: f32[44,22], index: 7, kind: input, shape index: {}]   ;;  %s1646_s8 = inlined_call_operand.vmem [shape: f32[1,22], index: 8, kind: input, shape index: {}]   ;;  %s1647_s9 = inlined_call_operand.vmem [shape: f32[66,30], index: 9, kind: input, shape index: {}]   ;;  %s1648_s13 = inlined_call_operand.vmem [shape: f32[2,66], index: 13, kind: input, shape index: {}]   ;;  %s1649_s11 = inlined_call_operand.vmem [shape: f32[30,1], index: 11, kind: input, shape index: {}]   ;;  %s1650_s12 = inlined_call_operand.<no memory space> [shape: f32[1,1], index: 12, kind: input, shape index: {}]   ;;  %s1651_s10 = inlined_call_operand.vmem [shape: f32[1,30], index: 10, kind: input, shape index: {}]   ;;  %s1652_s14 = inlined_call_operand.vmem [shape: f32[2,30], index: 14, kind: input, shape index: {}]   ;;  %s1653_s15 = inlined_call_operand.vmem [shape: f32[2,1], index: 15, kind: output, shape index: {}]  }
   0x1   :  { %v55_v0 = vld [vmem:[%s1638_s0] sm:$0xff]  ;;  %v56_v1 = vld [vmem:[%s1638_s0 + $0x8] sm:$0xf]  ;;  %vm1431_vm3 = vmpackc.low %vm64_vm0, %vm1337_vm2  ;;  %vm163_vm5 = vcmask 130048   ;;  %v1339_v15 = vmov 0.0|0.0   ;;  %vm1340_vm6 = vmmov 0  }
   0x2   :  { %v1249_v3 = vpack.c.bf16 %v56_v1, %v55_v0  ;;  %v1438_v4 = vld [vmem:[%s1639_s1] sm:$0xff]  ;;  %v1449_v5 = vld [vmem:[%s1639_s1 + $0x8] sm:$0xf]  ;;  %1259 = vmatprep.subr.bf16.mxu0 %v1339_v15  ;;  %v1341_v24 = vmov 0.0   ;;  %v411_v29 = vld [vmem:[%s1643_s5 + $0x10] sm:$0xff]  ;;  %vm406_vm7 = vcmask 179200  }
   0x3   :  { %1142 = vmatprep.mubr.msk.f32.mxu1 %vm57_vm1, %v1438_v4  ;;  %v154_v6 = vld [vmem:[%s1640_s3] sm:$0xff]  ;;  %v155_v7 = vld [vmem:[%s1640_s3 + $0x8] sm:$0xff]  ;;  %1156 = vmatprep.mubr.msk.f32.mxu0 %vm1340_vm6, %v1341_v24  ;;  %v412_v30 = vld [vmem:[%s1643_s5 + $0x18] sm:$0xff]  ;;  %vm422_vm8 = vcmask 359424   ;;  %vm872_vm9 = vcmask 1041408   ;;  %s1343_s17 = smov 44  }
   0x4   :  { %1251 = vmatprep.subr.msk.bf16.mxu1 %vm1431_vm3, %v1249_v3  ;;  %v1255_v8 = vpack.c.bf16 %v155_v7, %v154_v6  ;;  %v1053_v16 = vld [vmem:[%s1641_s4] ss:$0 sm:$0xff]  ;;  %v410_v27 = vld [vmem:[%s1643_s5 + $0x8] sm:$0xff]  ;;  %v1273_v31 = vpack.c.bf16 %v412_v30, %v411_v29  ;;  %v669_v53 = vld [vmem:[%s1645_s7 + $0x10] sm:$0xff]  ;;  %vm868_vm10 = vcmask 539648   ;;  %vm967_vm11 = vcmask 1045504  }
   0x5   :  { %1254 = vmatpush3.bf16.msk.msra.mxu1 %vm1431_vm3, %v1249_v3  ;;  %v1479_v25 = vld [vmem:[%s1642_s2] sm:$0x3]  ;;  %v414_v33 = vld [vmem:[%s1643_s5 + $0x28] sm:$0xf]  ;;  %v670_v55 = vld [vmem:[%s1645_s7 + $0x18] sm:$0xff]  ;;  %vm963_vm14 = vcmask 244736  }
   0x6   :  { %1256 = vmatprep.subr.bf16.mxu1 %v1255_v8  ;;  %v409_v26 = vld [vmem:[%s1643_s5] sm:$0xff]  ;;  %v668_v52 = vld [vmem:[%s1645_s7 + $0x8] sm:$0xff]  ;;  %v1297_v56 = vpack.c.bf16 %v670_v55, %v669_v53  ;;  %v854_v2 = vld [vmem:[%s1647_s9 + $0x10] sm:$0xff]  ;;  %vm1044_vm0 = vcmask 1024  }
   0x7   :  { %v1269_v28 = vpack.c.bf16 %v410_v27, %v409_v26  ;;  %v413_v32 = vld [vmem:[%s1643_s5 + $0x20] sm:$0xff]  ;;  %v672_v58 = vld [vmem:[%s1645_s7 + $0x28] sm:$0xf]  ;;  %vm1328_vm12 = vmpackc.low %vm967_vm11, %vm1337_vm2 }
   0x8   :  { %1143 = vmatmul.mubr.msk.f32.vlgmr.msra.gmra.mrb[0].mxu1 %vm57_vm1, %v1449_v5  ;;  %v1277_v34 = vpack.c.bf16 %v414_v33, %v413_v32  ;;  %v1061_v43 = vld [vmem:[%s1644_s6] ss:$0 sm:$0xff] }
   0x9   :  { %1258 = vmatpush3.bf16.msra.mxu1 %v1255_v8  ;;  %v667_v51 = vld [vmem:[%s1645_s7] sm:$0xff] }
   0xa   :  { %v1293_v54 = vpack.c.bf16 %v668_v52, %v667_v51  ;;  %v671_v57 = vld [vmem:[%s1645_s7 + $0x20] sm:$0xff] }
   0xb   :  { %v1301_v59 = vpack.c.bf16 %v672_v58, %v671_v57  ;;  %v860_v26 = vld [vmem:[%s1647_s9 + $0x40] sm:$0x3] }
   0xc   :  { %v849_v30 = vld [vmem:[%s1648_s13] sm:$0x3] }
  0xdb   :  { %v1144_v9 = vpop.f32.mrb[0].mxu1 }
  0xdc   :  { %v134_v10 = vpop.f32.mrb[1].mxu1 }
  0xdd   :  { %145 = vrot.lane.b32.xlu0 %v134_v10, %s1338_s29 }
  0xe1   :  { %147 = vrot.lane.b32.xlu0 %v1144_v9, %s1338_s29 }
 0x14f   :  { %v146_v11 = vpop.permute.xlu0 %145 }
 0x150   :  { %v152_v12 = vsel %vm151_vm4, %v55_v0, %v146_v11 }
 0x151   :  { %1149 = vmatprep.mubr.msk.f32.mxu1 %vm163_vm5, %v152_v12 }
 0x153   :  { %v148_v13 = vpop.permute.xlu0 %147 }
 0x154   :  { %v153_v14 = vsel %vm151_vm4, %v56_v1, %v148_v13  ;;  %v852_v13 = vld [vmem:[%s1647_s9] sm:$0xff] }
 0x155   :  { %1150 = vmatmul.mubr.msk.f32.vlgmr.msra.gmra.mrb[2].mxu1 %vm163_vm5, %v153_v14  ;;  %v853_v14 = vld [vmem:[%s1647_s9 + $0x8] sm:$0xff] }
 0x156   :  { %1163 = vmatprep.mubr.msk.f32.mxu1 %vm57_vm1, %v1438_v4 }
 0x228   :  { %v1151_v17 = vpop.f32.mrb[2].mxu1 }
 0x229   :  { %v242_v18 = vadd.f32 %v1151_v17, %v1053_v16  ;;  %v236_v19 = vpop.f32.mrb[3].mxu1  ;;  %v855_v17 = vld [vmem:[%s1647_s9 + $0x18] sm:$0xff] }
 0x22a   :  { %v237_v20 = vadd.f32 %v1053_v16, %v236_v19  ;;  %v1312_v16 = vpack.c.bf16 %v853_v14, %v852_v13  ;;  %v856_v19 = vld [vmem:[%s1647_s9 + $0x20] sm:$0xff] }
 0x22b   :  { %v246_v21 = vmax.f32 %v242_v18, 0.0  ;;  %v1315_v18 = vpack.c.bf16 %v855_v17, %v854_v2 }
 0x22c   :  { %v245_v22 = vmax.f32 %v237_v20, 0.0  ;;  %v857_v20 = vld [vmem:[%s1647_s9 + $0x28] sm:$0xff] }
 0x22e   :  { %v1260_v23 = vpack.c.bf16 %v246_v21, %v245_v22 }
 0x230   :  { %1262 = vmatpush3.bf16.msk.msra.mxu0 %vm1431_vm3, %v1260_v23  ;;  %1265 = vmatprep.subr.msk.bf16.mxu1 %vm1431_vm3, %v1260_v23 }
 0x231   :  { %1268 = vmatpush3.bf16.msk.msra.mxu1 %vm1431_vm3, %v1260_v23  ;;  %1270 = vmatprep.subr.bf16.mxu0 %v1269_v28  ;;  %v859_v23 = vld [vmem:[%s1647_s9 + $0x38] sm:$0xff] }
 0x232   :  { %1283 = vmatprep.subr.bf16.mxu1 %v1339_v15 }
 0x233   :  { %1157 = vmatmul.mubr.msk.f32.vlgmr.msra.gmra.mrb[0].mxu0 %vm57_vm1, %v1479_v25 }
 0x234   :  { %1164 = vmatmul.mubr.msk.f32.vlgmr.msra.gmra.mrb[4].mxu1 %vm57_vm1, %v1449_v5  ;;  %1272 = vmatpush3.bf16.msra.mxu0 %v1269_v28 }
 0x235   :  { %1185 = vmatprep.mubr.msk.f32.mxu1 %vm1340_vm6, %v1341_v24  ;;  %1274 = vmatprep.subr.bf16.mxu0 %v1273_v31 }
 0x238   :  { %1276 = vmatpush3.bf16.msra.mxu0 %v1273_v31 }
 0x239   :  { %1279 = vmatprep.subr.msk.bf16.mxu0 %vm1431_vm3, %v1277_v34 }
 0x23c   :  { %1282 = vmatpush3.bf16.msk.msra.mxu0 %vm1431_vm3, %v1277_v34 }
 0x23d   :  { %1307 = vmatprep.subr.bf16.mxu0 %v1339_v15 }
 0x306   :  { %v1510_v37 = vpop.f32.mrb[0].mxu0 }
 0x307   :  { %v1165_v35 = vpop.f32.mrb[4].mxu1  ;;  %v1158_v38 = vpop.f32.mrb[1].mxu0 }
 0x308   :  { %v389_v36 = vpop.f32.mrb[5].mxu1 }
 0x309   :  { %400 = vrot.lane.b32.xlu1 %v389_v36, %s1342_s26  ;;  %v953_v36 = vld [vmem:[%s1649_s11 + $0x8] sm:$0xff] }
 0x30d   :  { %402 = vrot.lane.b32.xlu1 %v1165_v35, %s1342_s26  ;;  %v952_v35 = vld [vmem:[%s1649_s11] sm:$0xff] }
 0x30e   :  { %v1324_v38 = vpack.c.bf16 %v953_v36, %v952_v35 }
 0x37b   :  { %v401_v39 = vpop.permute.xlu1 %400 }
 0x37c   :  { %v407_v40 = vsel %vm406_vm7, %v245_v22, %v401_v39  ;;  %v858_v22 = vld [vmem:[%s1647_s9 + $0x30] sm:$0xff]  ;;  %v955_v39 = vld [vmem:[%s1649_s11 + $0x18] sm:$0x3f] }
 0x37d   :  { %1178 = vmatprep.mubr.msk.f32.mxu0 %vm422_vm8, %v407_v40 }
 0x37f   :  { %v403_v41 = vpop.permute.xlu1 %402 }
 0x380   :  { %v408_v42 = vsel %vm406_vm7, %v246_v21, %v403_v41  ;;  %v1318_v21 = vpack.c.bf16 %v857_v20, %v856_v19  ;;  %v20_v41 = vstv %s1650_s12 }
 0x381   :  { %1179 = vmatmul.mubr.msk.f32.vlgmr.msra.gmra.mrb[2].mxu0 %vm422_vm8, %v408_v42  ;;  %21 = vst [vmem:[#allocation2] sm:$0x1] %v20_v41 }
 0x382   :  { %1214 = vmatprep.mubr.msk.f32.mxu0 %vm1340_vm6, %v1341_v24 }
 0x454   :  { %v1180_v44 = vpop.f32.mrb[2].mxu0 }
 0x455   :  { %v504_v45 = vadd.f32 %v1180_v44, %v1061_v43  ;;  %v498_v46 = vpop.f32.mrb[3].mxu0 }
 0x456   :  { %v499_v47 = vadd.f32 %v1061_v43, %v498_v46  ;;  %v949_v46 = vld [vmem:[%s1652_s14] sm:$0x3] }
 0x457   :  { %v508_v48 = vmax.f32 %v504_v45, 0.0 }
 0x458   :  { %v507_v49 = vmax.f32 %v499_v47, 0.0 }
 0x45a   :  { %v1284_v50 = vpack.c.bf16 %v508_v48, %v507_v49 }
 0x45c   :  { %1286 = vmatpush3.bf16.msk.msra.mxu1 %vm1431_vm3, %v1284_v50 }
 0x45d   :  { %1289 = vmatprep.subr.msk.bf16.mxu1 %vm1431_vm3, %v1284_v50 }
 0x45f   :  { %1186 = vmatmul.mubr.msk.f32.vlgmr.msra.gmra.mrb[6].mxu1 %vm57_vm1, %v1479_v25 }
 0x460   :  { %1292 = vmatpush3.bf16.msk.msra.mxu1 %vm1431_vm3, %v1284_v50  ;;  %1192 = vmatprep.mubr.msk.f32.mxu1 %vm57_vm1, %v1438_v4  ;;  %v1079_v50 = vld [vmem:[#allocation2] ss:$0 sm:$0xff] }
 0x461   :  { %1294 = vmatprep.subr.bf16.mxu1 %v1293_v54 }
 0x463   :  { %1193 = vmatmul.mubr.msk.f32.vlgmr.msra.gmra.mrb[8].mxu1 %vm57_vm1, %v1449_v5  ;;  %v1070_v5 = vld [vmem:[%s1646_s8] ss:$0 sm:$0xff] }
 0x464   :  { %1296 = vmatpush3.bf16.msra.mxu1 %v1293_v54 }
 0x465   :  { %1298 = vmatprep.subr.bf16.mxu1 %v1297_v56 }
 0x468   :  { %1300 = vmatpush3.bf16.msra.mxu1 %v1297_v56 }
 0x469   :  { %1303 = vmatprep.subr.msk.bf16.mxu1 %vm1431_vm3, %v1301_v59 }
 0x46c   :  { %1306 = vmatpush3.bf16.msk.msra.mxu1 %vm1431_vm3, %v1301_v59 }
 0x46d   :  { %1323 = vmatprep.subr.bf16.mxu1 %v1339_v15 }
 0x532   :  { %v578_v60 = vpop.f32.mrb[6].mxu1 }
 0x533   :  { %v1187_v61 = vpop.f32.mrb[7].mxu1 }
 0x536   :  { %v1194_v62 = vpop.f32.mrb[8].mxu1 }
 0x537   :  { %661 = vrot.lane.b32.xlu1 %v1194_v62, %s1342_s26  ;;  %v648_v63 = vpop.f32.mrb[9].mxu1 }
 0x538   :  { %659 = vrot.lane.b32.xlu0 %v648_v63, %s1342_s26 }
 0x53c   :  { %840 = vrot.lane.b32.xlu0 %v578_v60, %s1342_s26 }
 0x5a9   :  { %v662_v0 = vpop.permute.xlu1 %661 }
 0x5aa   :  { %v660_v1 = vpop.permute.xlu0 %659  ;;  %v666_v4 = vsel %vm406_vm7, %v508_v48, %v662_v0 }
 0x5ab   :  { %v665_v3 = vsel %vm406_vm7, %v507_v49, %v660_v1 }
 0x5ac   :  { %1207 = vmatprep.mubr.msk.f32.mxu1 %vm422_vm8, %v665_v3 }
 0x5ad   :  { %1208 = vmatmul.mubr.msk.f32.vlgmr.msra.gmra.mrb[10].mxu1 %vm422_vm8, %v666_v4 }
 0x5ae   :  { %1246 = vmatprep.mubr.msk.f32.mxu1 %vm1340_vm6, %v1341_v24  ;;  %v841_v29 = vpop.permute.xlu0 %840  ;;  %1325 = vmatpush3.bf16.msra.mxu1 %v1324_v38 }
 0x5af   :  { %v847_v31 = vsel %vm406_vm7, %v1510_v37, %v841_v29  ;;  %1326 = vmatprep.subr.bf16.mxu1 %v1339_v15  ;;  %v954_v37 = vld [vmem:[%s1649_s11 + $0x10] sm:$0xff] }
 0x5b0   :  { %v1327_v40 = vpack.c.bf16 %v955_v39, %v954_v37 }
 0x5b2   :  { %1329 = vmatpush3.bf16.msk.msra.mxu1 %vm1328_vm12, %v1327_v40 }
 0x680   :  { %v1209_v6 = vpop.f32.mrb[10].mxu1 }
 0x681   :  { %v761_v7 = vadd.f32 %v1209_v6, %v1070_v5  ;;  %v755_v8 = vpop.f32.mrb[11].mxu1 }
 0x682   :  { %v756_v9 = vadd.f32 %v1070_v5, %v755_v8 }
 0x683   :  { %v765_v10 = vmax.f32 %v761_v7, 0.0 }
 0x684   :  { %v764_v11 = vmax.f32 %v756_v9, 0.0 }
 0x686   :  { %v1308_v12 = vpack.c.bf16 %v765_v10, %v764_v11 }
 0x688   :  { %1310 = vmatpush3.bf16.msk.msra.mxu0 %vm1431_vm3, %v1308_v12 }
 0x689   :  { %1311 = vmatprep.subr.bf16.mxu0 %v1339_v15 }
 0x68b   :  { %1215 = vmatmul.mubr.msk.f32.vlgmr.msra.gmra.mrb[4].mxu0 %vm57_vm1, %v1479_v25  ;;  %v1321_v25 = vpack.c.bf16 %v859_v23, %v858_v22 }
 0x68c   :  { %1235 = vmatprep.mubr.msk.f32.mxu0 %vm1340_vm6, %v1341_v24  ;;  %1313 = vmatpush3.bf16.msra.mxu0 %v1312_v16 }
 0x68d   :  { %1314 = vmatprep.subr.bf16.mxu0 %v1339_v15 }
 0x690   :  { %1316 = vmatpush3.bf16.msra.mxu0 %v1315_v18 }
 0x691   :  { %1317 = vmatprep.subr.bf16.mxu0 %v1339_v15 }
 0x694   :  { %1319 = vmatpush3.bf16.msra.mxu0 %v1318_v21 }
 0x695   :  { %1320 = vmatprep.subr.bf16.mxu0 %v1339_v15  ;;  %v1076_v15 = vld [vmem:[%s1651_s10] ss:$0 sm:$0xff] }
 0x698   :  { %1322 = vmatpush3.bf16.msra.mxu0 %v1321_v25 }
 0x699   :  { %1233 = vmatprep.subr.mxu0 %v1341_v24 }
 0x69c   :  { %1234 = vmatpush3.msk.msra.mxu0 %vm872_vm9, %v860_v26 }
 0x75e   :  { %v835_v27 = vpop.f32.mrb[4].mxu0 }
 0x75f   :  { %844 = vrot.lane.b32.xlu1 %v835_v27, %s1343_s17  ;;  %v1216_v28 = vpop.f32.mrb[5].mxu0 }
 0x7d1   :  { %v845_v32 = vpop.permute.xlu1 %844 }
 0x7d2   :  { %v848_v24 = vsel %vm422_vm8, %v847_v31, %v845_v32 }
 0x7d3   :  { %v850_v33 = vmul.f32 %v849_v30, %v848_v24 }
 0x7d5   :  { %v851_v34 = vmul.f32 2.0, %v850_v33 }
 0x7d7   :  { %1236 = vmatmul.mubr.msk.f32.vlgmr.msra.gmra.mrb[6].mxu0 %vm868_vm10, %v851_v34 }
 0x8aa   :  { %v942_v42 = vpop.f32.mrb[6].mxu0 }
 0x8ab   :  { %v943_v43 = vadd.f32 %v1076_v15, %v942_v42  ;;  %v1237_v44 = vpop.f32.mrb[7].mxu0 }
 0x8ad   :  { %vm946_vm13 = vcmp.gt.f32.partialorder %v943_v43, 0.0  ;;  %v947_v45 = vmul.f32 0.01, %v943_v43 }
 0x8af   :  { %v948_v47 = vsel %vm946_vm13, %v943_v43, %v947_v45 }
 0x8b0   :  { %v950_v48 = vmul.f32 %v949_v46, %v948_v47 }
 0x8b2   :  { %v951_v49 = vmul.f32 2.0, %v950_v48 }
 0x8b4   :  { %1247 = vmatmul.mubr.msk.f32.vlgmr.msra.gmra.mrb[12].mxu1 %vm963_vm14, %v951_v49 }
 0x987   :  { %v1037_v51 = vpop.f32.mrb[12].mxu1 }
 0x988   :  { %v1038_v52 = vadd.f32 %v1079_v50, %v1037_v51  ;;  %v1248_v53 = vpop.f32.mrb[13].mxu1 }
 0x98a   :  { %vm1041_vm15 = vcmp.gt.f32.partialorder %v1038_v52, 0.0  ;;  %v1042_v54 = vmul.f32 0.01, %v1038_v52 }
 0x98c   :  { %v1043_v55 = vsel %vm1041_vm15, %v1038_v52, %v1042_v54 }
 0x98d   :  { %1045 = vst.msk [vmem:[%s1653_s15] sm:$0x3] %vm1044_vm0, %v1043_v55 }

</bundles_post_ra>
